<compile_context>
chip_gen: v5e
topology: v5e:2x2
jax: 0.10.0
libtpu: 0.0.40
codegen_flags: <defaults>
</compile_context>

<pallas_src>
from functools import partial

import jax
import jax.numpy as jnp
import numpy as np
from jax import lax
from jax.experimental import pallas as pl
from jax.experimental.pallas import tpu as pltpu  # noqa: F401  (TPU backend)


# ----------------------------------------------------------------------------
# Kernels
# ----------------------------------------------------------------------------
def _mynet_encode_kernel(x_ref, feat_ref, *, inv_hw):
    # x_ref:    [R, K, HW] (VMEM, native dtype), with R*K == B*C
    # feat_ref: [R, K]     (f32).  When R == 1 and K == B*C (a multiple of 128)
    # the store is lane-dense (no masked vst.msk partial stores).
    x = x_ref[...].astype(jnp.float32)
    # adaptive_avg_pool2d((1,1)) + squeeze: mean over the spatial (lane) axis.
    feat_ref[...] = jnp.sum(x, axis=-1) * inv_hw


def _mynet_logits_kernel(x_ref, w_ref, logits_ref, *, mode, temperature,
                         inv_hw, weight_prenormalized):
    # x_ref:      [B, C, HW]  (VMEM, native dtype)
    # w_ref:      [NCP, C]    (VMEM, native dtype; rows >= num_classes zero pad)
    # logits_ref: [B, NCP]    (f32, lane-dense: NCP is a multiple of 128)
    #
    # Pooling and normalization math in f32; only the MXU operands are cast to
    # bf16 immediately before the matmul (native bf16 MXU mode on all gens).
    x = x_ref[...].astype(jnp.float32)
    feat = jnp.sum(x, axis=-1) * inv_hw                      # [B, C] mean pool

    # Contract over C directly (rhs contracting dim = 1) -> no transpose of W.
    dn = (((1,), (1,)), ((), ()))

    if 'cos' in mode:
        # F.normalize(v, p=2, dim=-1) == v / max(||v||, 1e-12)
        # == v * rsqrt(max(sum(v*v), 1e-24)); rsqrt runs on the EUP slot.
        f_inv = lax.rsqrt(jnp.maximum(
            jnp.sum(feat * feat, axis=-1, keepdims=True), 1e-24))
        fn = (feat * f_inv).astype(jnp.bfloat16)
        if weight_prenormalized:
            # Frozen, session-prepared classifier: rows already unit-norm; feed
            # straight from VMEM to the MXU, no f32 upcast of W at all.
            wn = w_ref[...].astype(jnp.bfloat16)
        else:
            w = w_ref[...].astype(jnp.float32)
            w_inv = lax.rsqrt(jnp.maximum(
                jnp.sum(w * w, axis=-1, keepdims=True), 1e-24))
            wn = (w * w_inv).astype(jnp.bfloat16)
        logits = temperature * lax.dot_general(
            fn, wn, dimension_numbers=dn, preferred_element_type=jnp.float32)
    else:  # 'dot'
        logits = lax.dot_general(
            feat.astype(jnp.bfloat16), w_ref[...].astype(jnp.bfloat16),
            dimension_numbers=dn, preferred_element_type=jnp.float32)

    logits_ref[...] = logits


# ----------------------------------------------------------------------------
# Host-side helpers / wrapper
# ----------------------------------------------------------------------------
def prepare_fc_weight(fc_weight, mode='cos', dtype=jnp.bfloat16):
    """Hoist per-call work out of the forward (call once per FSCIL session,
    the classifier is frozen between forwards):
      * pad the class dim to a multiple of 128 -> lane-dense logits store and a
        clean MXU N tile, no per-call jnp.pad dispatch / HBM round trip of W,
      * for the cos head, L2-normalize rows in f32 (removes the largest block
        of per-call VPU work from the kernel),
      * store in bf16 -> native MXU operand dtype, half the W DMA bytes.
    Pass the result with mynet_forward(..., fc_weight_prepared=True).
    NOTE: a weight prepared with a 'cos' mode (row-normalized) must NOT be
    reused for a 'dot' forward.
    """
    nc, _ = fc_weight.shape
    ncp = max(128, ((nc + 127) // 128) * 128)
    w = fc_weight.astype(jnp.float32)
    if 'cos' in mode:
        w = w * lax.rsqrt(jnp.maximum(
            jnp.sum(w * w, axis=-1, keepdims=True), 1e-24))
    if ncp != nc:
        w = jnp.pad(w, ((0, ncp - nc), (0, 0)))
    return w.astype(dtype)


def mynet_forward(x_nchw, fc_weight, mode='cos', temperature=16.0,
                  fc_weight_prepared=False, num_classes=None):
    """MYNET.forward.

    mode containing 'cos'  -> temperature-scaled cosine logits
    mode containing 'dot'  -> plain linear logits
    mode == 'encoder'      -> pooled features [B, C] (f32)

    fc_weight_prepared=True: fc_weight came from prepare_fc_weight() (class dim
    already padded to a multiple of 128 and, for the cos head, rows already
    L2-normalized).  This is the fast path.

    num_classes: if given, logits are sliced to [:, :num_classes]; if None and
    the weight is prepared, the padded [B, NCP] logits are returned so the
    consumer (loss/softmax) can mask/slice inside its own fusion (avoids a tiny
    standalone slice dispatch).  Unprepared weights default to slicing to the
    true class count to preserve the PyTorch module's output shape.

    Inputs are consumed in their native dtype (pass bf16 to halve DMA bytes);
    pooling/normalization arithmetic is f32, MXU operands are bf16.
    """
    B, C, H, W = x_nchw.shape
    HW = H * W
    inv_hw = 1.0 / float(HW)
    x3d = x_nchw.reshape(B, C, HW)  # free contiguous reshape, keep native dtype
    x_bytes = x3d.size * x3d.dtype.itemsize

    if mode == 'encoder':
        # Lane-dense feature store: (B, C) with C < 128 would hit masked
        # partial stores, so present the output as (1, B*C) when that is a
        # multiple of 128 (both reshapes are free, row-major contiguous).
        if C % 128 != 0 and (B * C) % 128 == 0:
            xk, out2d = x3d.reshape(1, B * C, HW), (1, B * C)
        else:
            xk, out2d = x3d, (B, C)
        feat = pl.pallas_call(
            partial(_mynet_encode_kernel, inv_hw=inv_hw),
            out_shape=jax.ShapeDtypeStruct(out2d, jnp.float32),
            grid=(1,),
            in_specs=[pl.BlockSpec(xk.shape, lambda i: (0, 0, 0))],
            out_specs=pl.BlockSpec(out2d, lambda i: (0, 0)),
            cost_estimate=pl.CostEstimate(
                flops=B * C * HW + B * C,
                transcendentals=0,
                bytes_accessed=x_bytes + B * C * 4),
        )(xk)
        # TODO(synk): features are returned in f32 regardless of input dtype
        # (matches the f32 reference; a bf16 PyTorch module would return bf16).
        return feat.reshape(B, C)

    if 'cos' not in mode and 'dot' not in mode:
        raise ValueError('Unknown mode')
    is_cos = 'cos' in mode

    NC = fc_weight.shape[0]
    if fc_weight_prepared:
        if NC % 128 != 0:
            raise ValueError('prepared fc_weight must have a class dim that is '
                             'a multiple of 128 (use prepare_fc_weight).')
        NCP, w = NC, fc_weight
    else:
        # Slow path: pad the class dim per call (extra XLA dispatch + HBM round
        # trip of W) and normalize W inside the kernel.  Prefer
        # prepare_fc_weight() once per session.
        NCP = max(128, ((NC + 127) // 128) * 128)
        w = fc_weight if NCP == NC else jnp.pad(fc_weight, ((0, NCP - NC), (0, 0)))
        if num_classes is None:
            num_classes = NC

    kernel = partial(_mynet_logits_kernel, mode=mode,
                     temperature=float(temperature), inv_hw=inv_hw,
                     weight_prenormalized=(fc_weight_prepared and is_cos))
    logits_p = pl.pallas_call(
        kernel,
        out_shape=jax.ShapeDtypeStruct((B, NCP), jnp.float32),
        # Small shapes -> single grid point, full-array blocks resident in VMEM
        # (<0.1 MiB total; no vmem_limit / pipelining / megacore needed).
        grid=(1,),
        in_specs=[pl.BlockSpec((B, C, HW), lambda i: (0, 0, 0)),
                  pl.BlockSpec((NCP, C), lambda i: (0, 0))],
        out_specs=pl.BlockSpec((B, NCP), lambda i: (0, 0)),
        cost_estimate=pl.CostEstimate(
            flops=2 * B * NCP * C + B * C * HW,
            transcendentals=(B + (0 if fc_weight_prepared else NCP)) if is_cos else 0,
            bytes_accessed=x_bytes + w.size * w.dtype.itemsize + B * NCP * 4),
    )(x3d, w)

    if num_classes is None:
        return logits_p            # padded [B, NCP]; consumer slices / masks
    return logits_p[:, :num_classes]


# ----------------------------------------------------------------------------
# Pure-JAX reference (mirrors the PyTorch forward)
# ----------------------------------------------------------------------------
def _reference_forward(x_nchw, fc_weight, mode='cos', temperature=16.0):
    feat = jnp.mean(x_nchw.astype(jnp.float32), axis=(2, 3))
    if mode == 'encoder':
        return feat
    w = fc_weight.astype(jnp.float32)
    if 'cos' in mode:
        fn = feat / jnp.maximum(jnp.linalg.norm(feat, axis=-1, keepdims=True), 1e-12)
        wn = w / jnp.maximum(jnp.linalg.norm(w, axis=-1, keepdims=True), 1e-12)
        return temperature * fn @ wn.T
    return feat @ w.T


if __name__ == "__main__":
    # cifar100 config: encoder = resnet20 -> num_features = 64, 8x8 feature map.
    B, C, H, W = 2, 64, 8, 8
    NUM_CLASSES = 100
    TEMPERATURE = 16.0

    key = jax.random.PRNGKey(0)
    kx, kw = jax.random.split(key)

    # Encoder output feature map (stand-in for resnet20(input)).
    x_f32 = jax.random.normal(kx, (B, C, H, W), dtype=jnp.float32)
    # nn.Linear(num_features, num_classes, bias=False) default init.
    bound = 1.0 / np.sqrt(C)
    fc_w = jax.random.uniform(kw, (NUM_CLASSES, C), dtype=jnp.float32,
                              minval=-bound, maxval=bound)

    ok = True

    # ---- primary fast path: bf16 activations + session-prepared bf16 weights
    x_bf16 = x_f32.astype(jnp.bfloat16)
    x_bf16_as_f32 = x_bf16.astype(jnp.float32)

    w_cos = prepare_fc_weight(fc_w, mode='cos')      # [128, 64] bf16, unit rows
    logits_pad = jax.block_until_ready(
        mynet_forward(x_bf16, w_cos, mode='cos', temperature=TEMPERATURE,
                      fc_weight_prepared=True))       # padded [B, 128], no slice
    ref = _reference_forward(x_bf16_as_f32, fc_w, mode='cos',
                             temperature=TEMPERATURE)
    ok &= logits_pad.shape == (B, 128)
    ok &= np.allclose(np.asarray(logits_pad[:, :NUM_CLASSES]), np.asarray(ref),
                      rtol=2e-2, atol=2e-1)

    w_dot = prepare_fc_weight(fc_w, mode='dot')      # padded only, not normalized
    out_dot = jax.block_until_ready(
        mynet_forward(x_bf16, w_dot, mode='dot', temperature=TEMPERATURE,
                      fc_weight_prepared=True, num_classes=NUM_CLASSES))
    ref = _reference_forward(x_bf16_as_f32, fc_w, mode='dot',
                             temperature=TEMPERATURE)
    ok &= out_dot.shape == (B, NUM_CLASSES)
    ok &= np.allclose(np.asarray(out_dot), np.asarray(ref), rtol=2e-2, atol=2e-2)

    # ---- unprepared / f32 fallback paths (per-call pad + in-kernel W norm)
    for mode, atol in (('cos', 2e-1), ('dot', 2e-2)):
        out = jax.block_until_ready(
            mynet_forward(x_f32, fc_w, mode=mode, temperature=TEMPERATURE))
        ref = _reference_forward(x_f32, fc_w, mode=mode, temperature=TEMPERATURE)
        ok &= out.shape == (B, NUM_CLASSES)
        ok &= np.allclose(np.asarray(out), np.asarray(ref), rtol=2e-2, atol=atol)

    # ---- encoder mode (lane-dense (1, B*C) = (1, 128) store path)
    feat = jax.block_until_ready(mynet_forward(x_f32, fc_w, mode='encoder'))
    ref = _reference_forward(x_f32, fc_w, mode='encoder')
    ok &= feat.shape == (B, C)
    ok &= np.allclose(np.asarray(feat), np.asarray(ref), rtol=1e-5, atol=1e-5)

    if ok:
        print("KERNEL_OK")
    else:
        print("KERNEL_MISMATCH")
</pallas_src>

<mosaic_0001>
module attributes {stable_mosaic.version = 11 : i64} {
  func.func @_mynet_logits_kernel(%arg0: i32, %arg1: memref<2x64x64xbf16, #tpu.memory_space<vmem>>, %arg2: memref<128x64xbf16, #tpu.memory_space<vmem>>, %arg3: memref<2x128xf32, #tpu.memory_space<vmem>>) attributes {dimension_semantics = [#tpu.dimension_semantics<arbitrary>], iteration_bounds = array<i64: 1>, scalar_prefetch = 0 : i64, scratch_operands = 0 : i64, tpu.core_type = #tpu.core_type<tc>, window_params = [{pipeline_mode = #tpu.pipeline_mode<synchronous>, transform_indices = @transform_0, window_bounds = array<i64: 2, 64, 64>}, {pipeline_mode = #tpu.pipeline_mode<synchronous>, transform_indices = @transform_1, window_bounds = array<i64: 128, 64>}, {pipeline_mode = #tpu.pipeline_mode<synchronous>, transform_indices = @transform_2, window_bounds = array<i64: 2, 128>}]} {
    %c0 = arith.constant 0 : index
    %c0_0 = arith.constant 0 : index
    %c0_1 = arith.constant 0 : index
    %0 = vector.load %arg1[%c0, %c0_0, %c0_1] : memref<2x64x64xbf16, #tpu.memory_space<vmem>>, vector<2x64x64xbf16>
    %1 = arith.extf %0 : vector<2x64x64xbf16> to vector<2x64x64xf32>
    %cst = arith.constant dense<0.000000e+00> : vector<2x64xf32>
    %2 = vector.multi_reduction <add>, %1, %cst [2] : vector<2x64x64xf32> to vector<2x64xf32>
    %cst_2 = arith.constant 1.562500e-02 : f32
    %3 = vector.broadcast %cst_2 : f32 to vector<2x64xf32>
    %4 = arith.mulf %2, %3 : vector<2x64xf32>
    %5 = arith.mulf %4, %4 : vector<2x64xf32>
    %cst_3 = arith.constant dense<0.000000e+00> : vector<2xf32>
    %6 = vector.multi_reduction <add>, %5, %cst_3 [1] : vector<2x64xf32> to vector<2xf32>
    %7 = vector.shape_cast %6 : vector<2xf32> to vector<2x1xf32>
    %cst_4 = arith.constant 1.000000e-24 : f32
    %8 = vector.broadcast %cst_4 : f32 to vector<2x1xf32>
    %9 = arith.maximumf %7, %8 : vector<2x1xf32>
    %10 = math.rsqrt %9 : vector<2x1xf32>
    %11 = vector.broadcast %10 : vector<2x1xf32> to vector<2x64xf32>
    %12 = arith.mulf %4, %11 : vector<2x64xf32>
    %13 = arith.truncf %12 : vector<2x64xf32> to vector<2x64xbf16>
    %c0_5 = arith.constant 0 : index
    %c0_6 = arith.constant 0 : index
    %14 = vector.load %arg2[%c0_5, %c0_6] : memref<128x64xbf16, #tpu.memory_space<vmem>>, vector<128x64xbf16>
    %cst_7 = arith.constant dense<0.000000e+00> : vector<2x128xf32>
    %15 = tpu.matmul %13, %14, %cst_7 {dimension_numbers = #tpu.dot_dimension_numbers<[1], [1], [0], [0], [0, 0, 1, 0], [], []>} : vector<2x64xbf16>, vector<128x64xbf16>, vector<2x128xf32> -> vector<2x128xf32>
    %cst_8 = arith.constant 1.600000e+01 : f32
    %16 = vector.broadcast %cst_8 : f32 to vector<2x128xf32>
    %17 = arith.mulf %16, %15 : vector<2x128xf32>
    %c0_9 = arith.constant 0 : index
    %c0_10 = arith.constant 0 : index
    %18 = vector.load %arg3[%c0_9, %c0_10] : memref<2x128xf32, #tpu.memory_space<vmem>>, vector<2x128xf32>
    tpu.vector_store %arg3[%c0_9, %c0_10], %17 {strides = array<i32>} : memref<2x128xf32, #tpu.memory_space<vmem>>, vector<2x128xf32>,
    return
  }
  func.func @transform_0(%arg0: i32) -> (i32, i32, i32) {
    %c0_i32 = arith.constant 0 : i32
    %c0_i32_0 = arith.constant 0 : i32
    %c0_i32_1 = arith.constant 0 : i32
    %c0_i32_2 = arith.constant 0 : i32
    return %c0_i32, %c0_i32_0, %c0_i32_1 : i32, i32, i32
  }
  func.func @transform_1(%arg0: i32) -> (i32, i32) {
    %c0_i32 = arith.constant 0 : i32
    %c0_i32_0 = arith.constant 0 : i32
    %c0_i32_1 = arith.constant 0 : i32
    return %c0_i32, %c0_i32_0 : i32, i32
  }
  func.func @transform_2(%arg0: i32) -> (i32, i32) {
    %c0_i32 = arith.constant 0 : i32
    %c0_i32_0 = arith.constant 0 : i32
    %c0_i32_1 = arith.constant 0 : i32
    return %c0_i32, %c0_i32_0 : i32, i32
  }
}

</mosaic_0001>

<bundles_post_ra>
// kernel: tpu_custom_call.1
= control target key start
LH: loop header
LB: loop body
LE: loop exit
PB: predicated region body
PF: predicated region fallthrough
CT: control target
= control target key end

     0   :  { %vm44_vm0 = vcmask 523264   ;;  %s823_s0 = inlined_call_operand.vmem [shape: bf16[2,64,64], index: 0, kind: input, shape index: {}]   ;;  %s824_s1 = inlined_call_operand.vmem [shape: bf16[128,64], index: 1, kind: input, shape index: {}]   ;;  %s825_s2 = inlined_call_operand.hbm [shape: f32[2,128], index: 2, kind: output, shape index: {}]  }
   0x1   :  { %v528_v0 = vld [vmem:[%s823_s0 + $0x20] sm:$0xff]   ;;  %v525_v2 = vld [vmem:[%s823_s0 + $0x8] sm:$0xff]  }
   0x2   :  { %v494_v1 = vld [vmem:[%s823_s0] sm:$0xff]   ;;  %v511_v3 = vunpack.c.l.bf16 %v528_v0  ;;  %v499_v5 = vunpack.c.l.bf16 %v525_v2 }
   0x3   :  { %v495_v4 = vunpack.c.l.bf16 %v494_v1 }
   0x4   :  { %7 = vsyncpa [#allocation3], 0  ;;  %v69_v6 = vsel %vm44_vm0, %v511_v3, 0.0  ;;  %v51_v8 = vsel %vm44_vm0, %v499_v5, 0.0  ;;  %v529_v9 = vld [vmem:[%s823_s0 + $0x28] sm:$0xff]   ;;  %v512_v10 = vunpack.c.h.bf16 %v528_v0  ;;  %v496_v11 = vunpack.c.h.bf16 %v494_v1  ;;  %v526_v16 = vld [vmem:[%s823_s0 + $0x10] sm:$0xff]  }
   0x5   :  { %v45_v7 = vsel %vm44_vm0, %v495_v4, 0.0  ;;  %70 = vadd.xlane.f32.xlu1 %v69_v6  ;;  %52 = vadd.xlane.f32.xlu2 %v51_v8  ;;  %v515_v12 = vunpack.c.l.bf16 %v529_v9  ;;  %v516_v17 = vunpack.c.h.bf16 %v529_v9  ;;  %v500_v18 = vunpack.c.h.bf16 %v525_v2  ;;  %v530_v23 = vld [vmem:[%s823_s0 + $0x30] sm:$0xff]   ;;  %v531_v30 = vld [vmem:[%s823_s0 + $0x38] sm:$0xff]   ;;  %s443_s15 = sshll.u32 %s825_s2, 4  ;;  %s444_s15 = int_to_ptr.hbm [resolvable:$true] %s443_s15 }
   0x6   :  { %46 = vadd.xlane.f32.xlu0 %v45_v7  ;;  %v72_v13 = vsel %vm44_vm0, %v512_v10, 0.0  ;;  %v48_v14 = vsel %vm44_vm0, %v496_v11, 0.0  ;;  %v503_v19 = vunpack.c.l.bf16 %v526_v16  ;;  %v504_v24 = vunpack.c.h.bf16 %v526_v16  ;;  %v527_v31 = vld [vmem:[%s823_s0 + $0x18] sm:$0xff]  }
   0x7   :  { %v75_v15 = vsel %vm44_vm0, %v515_v12, 0.0  ;;  %v78_v20 = vsel %vm44_vm0, %v516_v17, 0.0  ;;  %v54_v21 = vsel %vm44_vm0, %v500_v18, 0.0  ;;  %v519_v25 = vunpack.c.l.bf16 %v530_v23 }
   0x8   :  { %v57_v22 = vsel %vm44_vm0, %v503_v19, 0.0  ;;  %v520_v26 = vunpack.c.h.bf16 %v530_v23  ;;  %v60_v27 = vsel %vm44_vm0, %v504_v24, 0.0  ;;  %v523_v32 = vunpack.c.l.bf16 %v531_v30 }
   0x9   :  { %v81_v28 = vsel %vm44_vm0, %v519_v25, 0.0  ;;  %v507_v33 = vunpack.c.l.bf16 %v527_v31  ;;  %v508_v34 = vunpack.c.h.bf16 %v527_v31  ;;  %v524_v38 = vunpack.c.h.bf16 %v531_v30 }
   0xa   :  { %v84_v29 = vsel %vm44_vm0, %v520_v26, 0.0  ;;  %v87_v35 = vsel %vm44_vm0, %v523_v32, 0.0  ;;  %v141_v49 = vlaneseq  ;;  %vm146_vm1 = vcmask 130112  }
   0xb   :  { %v63_v36 = vsel %vm44_vm0, %v507_v33, 0.0  ;;  %v66_v37 = vsel %vm44_vm0, %v508_v34, 0.0  ;;  %v90_v39 = vsel %vm44_vm0, %v524_v38, 0.0  ;;  %vm150_vm2 = vcmask 195712  }
   0xc   :  { %v628_v55 = vand.u32 127, %v141_v49  ;;  %vm154_vm3 = vcmask 261312   ;;  %vm158_vm4 = vcmask 326912   ;;  %vm162_vm5 = vcmask 392512  }
   0xd   :  { %73 = vadd.xlane.f32.xlu1 %v72_v13  ;;  %76 = vadd.xlane.f32.xlu2 %v75_v15  ;;  %vm166_vm6 = vcmask 458112   ;;  %vm170_vm7 = vcmask 523712   ;;  %vm187_vm8 = vcmask 1041409   ;;  %vm190_vm9 = vcmask 517120  }
   0xe   :  { %49 = vadd.xlane.f32.xlu0 %v48_v14  ;;  %v635_v59 = vadd.s32 4294967288, %v628_v55  ;;  %v646_v0 = vadd.s32 4294967280, %v628_v55  ;;  %v657_v5 = vadd.s32 4294967272, %v628_v55  ;;  %v667_v10 = vadd.s32 4294967264, %v628_v55 }
   0xf   :  { %v676_v15 = vadd.s32 4294967256, %v628_v55  ;;  %v700_v32 = vadd.s32 4294967248, %v628_v55 }
  0x15   :  { %79 = vadd.xlane.f32.xlu1 %v78_v20  ;;  %58 = vadd.xlane.f32.xlu2 %v57_v22 }
  0x16   :  { %55 = vadd.xlane.f32.xlu0 %v54_v21 }
  0x1d   :  { %61 = vadd.xlane.f32.xlu1 %v60_v27  ;;  %85 = vadd.xlane.f32.xlu2 %v84_v29 }
  0x1e   :  { %82 = vadd.xlane.f32.xlu0 %v81_v28 }
  0x25   :  { %88 = vadd.xlane.f32.xlu1 %v87_v35  ;;  %67 = vadd.xlane.f32.xlu2 %v66_v37 }
  0x26   :  { %64 = vadd.xlane.f32.xlu0 %v63_v36 }
  0x2e   :  { %91 = vadd.xlane.f32.xlu0 %v90_v39 }
  0x78   :  { %v71_v40 = vpop.xlane.xlu1 %70  ;;  %v53_v42 = vpop.xlane.xlu2 %52 }
  0x79   :  { %v47_v41 = vpop.xlane.xlu0 %46  ;;  %v624_v51 = vmul.f32 0.015625, %v71_v40  ;;  %v632_v58 = vmul.f32 0.015625, %v53_v42 }
  0x7a   :  { %v626_v52 = vmul.f32 0.015625, %v47_v41 }
  0x7b   :  { %v117_v62 = vmul.f32 %v624_v51, %v624_v51  ;;  %v111_v4 = vmul.f32 %v632_v58, %v632_v58 }
  0x7c   :  { %v109_v63 = vmul.f32 %v626_v52, %v626_v52 }
  0x7d   :  { %v172_v12 = vperm.slane %v117_v62, %v628_v55  ;;  %v149_v23 = vperm.slane %v111_v4, %v646_v0 }
  0x7e   :  { %v143_v13 = vperm.slane %v109_v63, %v628_v55 }
  0x80   :  { %v74_v43 = vpop.xlane.xlu1 %73  ;;  %v77_v45 = vpop.xlane.xlu2 %76 }
  0x81   :  { %v50_v44 = vpop.xlane.xlu0 %49  ;;  %v630_v56 = vmul.f32 0.015625, %v74_v43  ;;  %v648_v1 = vmul.f32 0.015625, %v77_v45  ;;  %v716_v43 = vadd.s32 4294967240, %v628_v55 }
  0x82   :  { %v622_v50 = vmul.f32 0.015625, %v50_v44 }
  0x83   :  { %v118_v2 = vmul.f32 %v630_v56, %v630_v56  ;;  %v119_v14 = vmul.f32 %v648_v1, %v648_v1 }
  0x84   :  { %v110_v60 = vmul.f32 %v622_v50, %v622_v50 }
  0x85   :  { %v173_v18 = vperm.slane %v118_v2, %v635_v59  ;;  %v175_v31 = vperm.slane %v119_v14, %v646_v0 }
  0x86   :  { %v145_v8 = vperm.slane %v110_v60, %v635_v59 }
  0x87   :  { %v174_v34 = vsel %vm146_vm1, %v173_v18, %v172_v12  ;;  %v565_v18 = vmov 0  }
  0x88   :  { %v80_v46 = vpop.xlane.xlu1 %79  ;;  %v59_v48 = vpop.xlane.xlu2 %58  ;;  %v147_v27 = vsel %vm146_vm1, %v145_v8, %v143_v13  ;;  %v176_v45 = vsel %vm150_vm2, %v175_v31, %v174_v34  ;;  %536 = vset.pattern.permute.xlu1 %v565_v18  ;;  %535 = vset.pattern.permute.xlu0 %v565_v18 }
  0x89   :  { %v56_v47 = vpop.xlane.xlu0 %55  ;;  %v652_v3 = vmul.f32 0.015625, %v80_v46  ;;  %v659_v6 = vmul.f32 0.015625, %v59_v48  ;;  %v151_v37 = vsel %vm150_vm2, %v149_v23, %v147_v27  ;;  %534 = vset.pattern.permute.xlu2 %v565_v18  ;;  %v490_v18 = vld [vmem:[%s824_s1 + $0x28] sm:$0xff] }
  0x8a   :  { %v639_v61 = vmul.f32 0.015625, %v56_v47 }
  0x8b   :  { %v120_v19 = vmul.f32 %v652_v3, %v652_v3  ;;  %v113_v24 = vmul.f32 %v659_v6, %v659_v6 }
  0x8c   :  { %v112_v9 = vmul.f32 %v639_v61, %v639_v61 }
  0x8d   :  { %v177_v35 = vperm.slane %v120_v19, %v657_v5  ;;  %v157_v38 = vperm.slane %v113_v24, %v667_v10 }
  0x8e   :  { %v153_v28 = vperm.slane %v112_v9, %v657_v5 }
  0x8f   :  { %v178_v48 = vsel %vm154_vm3, %v177_v35, %v176_v45 }
  0x90   :  { %v62_v53 = vpop.xlane.xlu1 %61  ;;  %v86_v57 = vpop.xlane.xlu2 %85  ;;  %v155_v41 = vsel %vm154_vm3, %v153_v28, %v151_v37 }
  0x91   :  { %v83_v54 = vpop.xlane.xlu0 %82  ;;  %v669_v11 = vmul.f32 0.015625, %v62_v53  ;;  %v681_v20 = vmul.f32 0.015625, %v86_v57 }
  0x92   :  { %v661_v7 = vmul.f32 0.015625, %v83_v54  ;;  %v159_v54 = vsel %vm158_vm4, %v157_v38, %v155_v41 }
  0x93   :  { %v114_v29 = vmul.f32 %v669_v11, %v669_v11  ;;  %v122_v36 = vmul.f32 %v681_v20, %v681_v20 }
  0x94   :  { %v121_v25 = vmul.f32 %v661_v7, %v661_v7 }
  0x95   :  { %v161_v42 = vperm.slane %v114_v29, %v676_v15  ;;  %v181_v49 = vperm.slane %v122_v36, %v676_v15 }
  0x96   :  { %v179_v39 = vperm.slane %v121_v25, %v667_v10 }
  0x97   :  { %v163_v2 = vsel %vm162_vm5, %v161_v42, %v159_v54 }
  0x98   :  { %v89_v16 = vpop.xlane.xlu1 %88  ;;  %v68_v22 = vpop.xlane.xlu2 %67  ;;  %v180_v57 = vsel %vm158_vm4, %v179_v39, %v178_v48 }
  0x99   :  { %v65_v17 = vpop.xlane.xlu0 %64  ;;  %v690_v26 = vmul.f32 0.015625, %v89_v16  ;;  %v696_v30 = vmul.f32 0.015625, %v68_v22  ;;  %v182_v9 = vsel %vm162_vm5, %v181_v49, %v180_v57 }
  0x9a   :  { %v683_v21 = vmul.f32 0.015625, %v65_v17 }
  0x9b   :  { %v123_v40 = vmul.f32 %v690_v26, %v690_v26  ;;  %v116_v44 = vmul.f32 %v696_v30, %v696_v30 }
  0x9c   :  { %v115_v33 = vmul.f32 %v683_v21, %v683_v21 }
  0x9d   :  { %v183_v60 = vperm.slane %v123_v40, %v700_v32  ;;  %v169_v62 = vperm.slane %v116_v44, %v716_v43 }
  0x9e   :  { %v165_v46 = vperm.slane %v115_v33, %v700_v32 }
  0x9f   :  { %v184_v12 = vsel %vm166_vm6, %v183_v60, %v182_v9 }
  0xa0   :  { %v167_v4 = vsel %vm166_vm6, %v165_v46, %v163_v2 }
  0xa1   :  { %v92_v47 = vpop.xlane.xlu0 %91  ;;  %v171_v13 = vsel %vm170_vm7, %v169_v62, %v167_v4 }
  0xa2   :  { %v724_v53 = vmul.f32 0.015625, %v92_v47 }
  0xa4   :  { %v124_v63 = vmul.f32 %v724_v53, %v724_v53 }
  0xa6   :  { %v185_v8 = vperm.slane %v124_v63, %v716_v43 }
  0xa8   :  { %v186_v14 = vsel %vm170_vm7, %v185_v8, %v184_v12 }
  0xa9   :  { %v188_v16 = vsel %vm187_vm8, %v186_v14, %v171_v13 }
  0xaa   :  { %v191_v17 = vsel %vm190_vm9, %v188_v16, 0.0  ;;  %v492_v16 = vld [vmem:[%s824_s1 + $0x38] sm:$0xff] }
  0xab   :  { %192 = vadd.xlane.f32.xlu1 %v191_v17 }
 0x11e   :  { %v193_v19 = vpop.xlane.xlu1 %192 }
 0x11f   :  { %v194_v22 = vmax.f32 %v193_v19, 1e-24  ;;  %v413_v19 = vsel %vm44_vm0, %v490_v18, 0 }
 0x121   :  { %537 = vrsqrt.f32 %v194_v22  ;;  %vm201_vm11 = vweird.f32 %v194_v22 }
 0x127   :  { %v538_v23 = vpop.eup %537 }
 0x128   :  { %v196_v24 = vmul.f32 %v538_v23, %v194_v22  ;;  %vm202_vm10 = vweird.f32 %v538_v23  ;;  %v489_v22 = vld [vmem:[%s824_s1 + $0x20] sm:$0xff] }
 0x129   :  { %vm203_vm12 = vmor %vm201_vm11, %vm202_vm10 }
 0x12a   :  { %v197_v25 = vmul.f32 %v538_v23, %v196_v24 }
 0x12c   :  { %v198_v27 = vmul.f32 0.5, %v197_v25  ;;  %v488_v25 = vld [vmem:[%s824_s1 + $0x18] sm:$0xff] }
 0x12e   :  { %v199_v28 = vsub.f32 1.5, %v198_v27  ;;  %v407_v27 = vsel %vm44_vm0, %v488_v25, 0 }
 0x130   :  { %v200_v29 = vmul.f32 %v538_v23, %v199_v28 }
 0x132   :  { %v204_v31 = vsel %vm203_vm12, %v538_v23, %v200_v29  ;;  %v410_v23 = vsel %vm44_vm0, %v489_v22, 0  ;;  %v487_v29 = vld [vmem:[%s824_s1 + $0x10] sm:$0xff] }
 0x133   :  { %v206_v33 = vperm.slane %v204_v31, 0  ;;  %v207_v34 = vperm.slane %v204_v31, 1  ;;  %v404_v31 = vsel %vm44_vm0, %v487_v29, 0 }
 0x135   :  { %v218_v35 = vmul.f32 %v207_v34, %v624_v51  ;;  %v219_v36 = vmul.f32 %v207_v34, %v630_v56  ;;  %v210_v37 = vmul.f32 %v206_v33, %v626_v52  ;;  %v211_v38 = vmul.f32 %v206_v33, %v622_v50 }
 0x136   :  { %v220_v41 = vmul.f32 %v207_v34, %v648_v1  ;;  %v221_v42 = vmul.f32 %v207_v34, %v652_v3  ;;  %v214_v44 = vmul.f32 %v206_v33, %v659_v6  ;;  %v215_v48 = vmul.f32 %v206_v33, %v669_v11 }
 0x137   :  { %v230_v39 = vpack.c.bf16 %v219_v36, %v218_v35  ;;  %v226_v40 = vpack.c.bf16 %v211_v38, %v210_v37  ;;  %v222_v49 = vmul.f32 %v207_v34, %v661_v7  ;;  %v223_v1 = vmul.f32 %v207_v34, %v681_v20 }
 0x138   :  { %v231_v51 = vpack.c.bf16 %v221_v42, %v220_v41  ;;  %v228_v52 = vpack.c.bf16 %v215_v48, %v214_v44  ;;  %v212_v3 = vmul.f32 %v206_v33, %v632_v58  ;;  %v213_v6 = vmul.f32 %v206_v33, %v639_v61 }
 0x139   :  { %v266_v45 = vunpack.c.l.b16 %v230_v39  ;;  %v259_v46 = vunpack.c.h.b16 %v226_v40  ;;  %v258_v47 = vunpack.c.l.b16 %v226_v40  ;;  %v267_v54 = vunpack.c.h.b16 %v230_v39  ;;  %v485_v39 = vld [vmem:[%s824_s1] sm:$0xff] }
 0x13a   :  { %v268_v56 = vunpack.c.l.b16 %v231_v51  ;;  %v262_v50 = vunpack.c.l.b16 %v228_v52  ;;  %v232_v11 = vpack.c.bf16 %v223_v1, %v222_v49  ;;  %v227_v57 = vpack.c.bf16 %v213_v6, %v212_v3 }
 0x13b   :  { %299 = vperm.xlu1 %536, %v266_v45   ;;  %278 = vperm.xlu0 %535, %v259_v46   ;;  %v269_v60 = vunpack.c.h.b16 %v231_v51  ;;  %v216_v63 = vmul.f32 %v206_v33, %v683_v21  ;;  %v217_v2 = vmul.f32 %v206_v33, %v696_v30  ;;  %v263_v20 = vunpack.c.h.b16 %v228_v52 }
 0x13c   :  { %275 = vperm.xlu2 %534, %v258_v47   ;;  %v271_v62 = vunpack.c.h.b16 %v232_v11  ;;  %v260_v4 = vunpack.c.l.b16 %v227_v57  ;;  %v224_v61 = vmul.f32 %v207_v34, %v690_v26  ;;  %v225_v8 = vmul.f32 %v207_v34, %v724_v53  ;;  %v491_v53 = vld [vmem:[%s824_s1 + $0x30] sm:$0xff]  ;;  %v486_v34 = vld [vmem:[%s824_s1 + $0x8] sm:$0xff]  ;;  %s566_s1 = smov [#allocation2]  }
 0x13d   :  { %v229_v7 = vpack.c.bf16 %v217_v2, %v216_v63  ;;  %v261_v9 = vunpack.c.h.b16 %v227_v57  ;;  %v270_v21 = vunpack.c.l.b16 %v232_v11  ;;  %v419_v26 = vsel %vm44_vm0, %v492_v16, 0  ;;  %s441_s12 = sshll.u32 %s566_s1, 4  ;;  %s442_s12 = int_to_ptr.vmem [resolvable:$true] %s441_s12 }
 0x13e   :  { %v233_v12 = vpack.c.bf16 %v225_v8, %v224_v61  ;;  %421 = vmatpush.bf16.xpose.msra.mxu0 %v419_v26  ;;  %v416_v17 = vsel %vm44_vm0, %v491_v53, 0  ;;  %v401_v35 = vsel %vm44_vm0, %v486_v34, 0  ;;  %v398_v40 = vsel %vm44_vm0, %v485_v39, 0 }
 0x13f   :  { %v265_v58 = vunpack.c.h.b16 %v229_v7  ;;  %v264_v30 = vunpack.c.l.b16 %v229_v7 }
 0x140   :  { %v272_v13 = vunpack.c.l.b16 %v233_v12  ;;  %v273_v14 = vunpack.c.h.b16 %v233_v12 }
 0x143   :  { %305 = vperm.xlu1 %536, %v268_v56   ;;  %287 = vperm.xlu0 %535, %v262_v50  }
 0x144   :  { %302 = vperm.xlu2 %534, %v267_v54  }
 0x146   :  { %422 = vmatpush.bf16.xpose.msra.mxu0 %v416_v17 }
 0x14b   :  { %308 = vperm.xlu1 %536, %v269_v60   ;;  %314 = vperm.xlu0 %535, %v271_v62  }
 0x14c   :  { %281 = vperm.xlu2 %534, %v260_v4  }
 0x14e   :  { %423 = vmatpush.bf16.xpose.msra.mxu0 %v413_v19 }
 0x153   :  { %290 = vperm.xlu1 %536, %v263_v20   ;;  %296 = vperm.xlu0 %535, %v265_v58  }
 0x154   :  { %284 = vperm.xlu2 %534, %v261_v9  }
 0x156   :  { %424 = vmatpush.bf16.xpose.msra.mxu0 %v410_v23 }
 0x15b   :  { %317 = vperm.xlu1 %536, %v272_v13  }
 0x15c   :  { %311 = vperm.xlu2 %534, %v270_v21  }
 0x15e   :  { %425 = vmatpush.bf16.xpose.msra.mxu0 %v407_v27 }
 0x164   :  { %293 = vperm.xlu2 %534, %v264_v30  }
 0x166   :  { %426 = vmatpush.bf16.xpose.msra.mxu0 %v404_v31 }
 0x16c   :  { %320 = vperm.xlu2 %534, %v273_v14  }
 0x16e   :  { %427 = vmatpush.bf16.xpose.msra.mxu0 %v401_v35 }
 0x176   :  { %428 = vmatpush.bf16.xpose.msra.mxu0 %v398_v40 }
 0x196   :  { %v276_v24 = vpop.permute.xlu2 %275 }
 0x197   :  { %v322_v47 = vperm.slane %v276_v24, %v628_v55 }
 0x19e   :  { %v303_v28 = vpop.permute.xlu2 %302 }
 0x19f   :  { %v338_v1 = vperm.slane %v303_v28, %v635_v59 }
 0x1a6   :  { %v282_v33 = vpop.permute.xlu2 %281 }
 0x1a7   :  { %v325_v50 = vperm.slane %v282_v33, %v646_v0 }
 0x1ad   :  { %v300_v36 = vpop.permute.xlu1 %299  ;;  %v279_v37 = vpop.permute.xlu0 %278 }
 0x1ae   :  { %v285_v38 = vpop.permute.xlu2 %284  ;;  %v323_v46 = vperm.slane %v279_v37, %v635_v59  ;;  %v337_v52 = vperm.slane %v300_v36, %v628_v55 }
 0x1af   :  { %v327_v60 = vperm.slane %v285_v38, %v657_v5 }
 0x1b0   :  { %v324_v56 = vsel %vm146_vm1, %v323_v46, %v322_v47  ;;  %v339_v57 = vsel %vm146_vm1, %v338_v1, %v337_v52 }
 0x1b1   :  { %v326_v6 = vsel %vm150_vm2, %v325_v50, %v324_v56 }
 0x1b2   :  { %v328_v63 = vsel %vm154_vm3, %v327_v60, %v326_v6 }
 0x1b5   :  { %v306_v41 = vpop.permute.xlu1 %305  ;;  %v288_v42 = vpop.permute.xlu0 %287 }
 0x1b6   :  { %v312_v44 = vpop.permute.xlu2 %311  ;;  %v340_v49 = vperm.slane %v306_v41, %v646_v0  ;;  %v329_v11 = vperm.slane %v288_v42, %v667_v10 }
 0x1b7   :  { %v344_v2 = vperm.slane %v312_v44, %v667_v10 }
 0x1b8   :  { %v341_v62 = vsel %vm150_vm2, %v340_v49, %v339_v57  ;;  %v330_v59 = vsel %vm158_vm4, %v329_v11, %v328_v63 }
 0x1bd   :  { %v309_v45 = vpop.permute.xlu1 %308  ;;  %v315_v48 = vpop.permute.xlu0 %314 }
 0x1be   :  { %v294_v51 = vpop.permute.xlu2 %293  ;;  %v342_v54 = vperm.slane %v309_v45, %v657_v5  ;;  %v346_v61 = vperm.slane %v315_v48, %v676_v15 }
 0x1bf   :  { %v333_v20 = vperm.slane %v294_v51, %v700_v32 }
 0x1c0   :  { %v343_v0 = vsel %vm154_vm3, %v342_v54, %v341_v62 }
 0x1c1   :  { %v345_v7 = vsel %vm158_vm4, %v344_v2, %v343_v0 }
 0x1c2   :  { %v347_v13 = vsel %vm162_vm5, %v346_v61, %v345_v7 }
 0x1c5   :  { %v291_v3 = vpop.permute.xlu1 %290  ;;  %v297_v58 = vpop.permute.xlu0 %296 }
 0x1c6   :  { %v331_v55 = vperm.slane %v291_v3, %v676_v15  ;;  %v321_v5 = vpop.permute.xlu2 %320  ;;  %v335_v21 = vperm.slane %v297_v58, %v716_v43 }
 0x1c7   :  { %v350_v10 = vperm.slane %v321_v5, %v716_v43 }
 0x1c8   :  { %v332_v4 = vsel %vm162_vm5, %v331_v55, %v330_v59 }
 0x1c9   :  { %v334_v9 = vsel %vm166_vm6, %v333_v20, %v332_v4 }
 0x1ca   :  { %v336_v14 = vsel %vm170_vm7, %v335_v21, %v334_v9 }
 0x1cd   :  { %v318_v8 = vpop.permute.xlu1 %317 }
 0x1ce   :  { %v348_v12 = vperm.slane %v318_v8, %v700_v32 }
 0x1d0   :  { %v349_v30 = vsel %vm166_vm6, %v348_v12, %v347_v13 }
 0x1d1   :  { %v351_v16 = vsel %vm170_vm7, %v350_v10, %v349_v30 }
 0x1d2   :  { %v352_v26 = vsel %vm187_vm8, %v351_v16, %v336_v14 }
 0x1d3   :  { %v353_v15 = vpack.c.b16 %v352_v26, %v352_v26 }
 0x1d5   :  { %484 = vmatmul.msk.bf16.vlgmr.msra.gmra.mxu0 %vm44_vm0, %v353_v15 }
 0x252   :  { %v430_v32 = vpop.f32.mrf.mxu0 }
 0x253   :  { %v434_v53 = vmul.f32 16.0, %v430_v32 }
 0x255   :  { %435 = vst [vmem:[#allocation2] sm:$0x3] %v434_v53 }
 0x256   :  { %446 = dma.vmem_to_hbm [thread:$0]  %s442_s12, 32, %s444_s15, [#allocation3]  }
 0x25a   :  { %v432_v43 = vpop.f32.mrf.mxu0 }
 0x25b   :  { %563 = dma.done.wait [#allocation3], 32  }
 0x25c   :  { %564 = vsyncadd [#allocation3], 4294967264 }
 0x25d   :  { %451 = vsyncpa [#allocation3], 1 }

</bundles_post_ra>
